<compile_context>
chip_gen: v5e
topology: v5e:2x2
jax: 0.10.0
libtpu: 0.0.40
codegen_flags: <defaults>
</compile_context>

<pallas_src>
import functools
import math

import jax
import jax.numpy as jnp
from jax.experimental import pallas as pl
from jax.experimental.pallas import tpu as pltpu


_TARGET_BLOCK_BYTES = 512 * 1024       # per ref per block; ~85% of HBM roofline
_MAX_BLOCK_BYTES = 2 * 1024 * 1024     # hard cap per ref per block (v7x: 64 MiB VMEM)
_VMEM_LIMIT_BYTES = 32 * 1024 * 1024   # explicit scoped-VMEM budget (<= all gens)


def _round_up(x, m):
    return ((x + m - 1) // m) * m


def _sublane(dtype):
    # Packed-sublane granularity: 8 for 4-byte dtypes, 16 for 2-byte dtypes.
    return max(8, 32 // dtype.itemsize)


# ---------------------------------------------------------------------------
# Kernels.  Blocks always hold the full softmax (reduce) axis, so every grid
# step is independent of every other one (all axes "parallel").
# ---------------------------------------------------------------------------

def _real_softmax_kernel(x_ref, o_ref, *, axis):
    x = x_ref[...].astype(jnp.float32)
    m = jnp.max(x, axis=axis, keepdims=True)
    e = jnp.exp(x - m)
    s = jnp.sum(e, axis=axis, keepdims=True)
    # approx=False kept so the 1e-5 self-check tolerance holds unconditionally.
    o_ref[...] = (e * pl.reciprocal(s, approx=False)).astype(o_ref.dtype)


def _complex_softmax_kernel(re_ref, im_ref, ore_ref, oim_ref, *, axis):
    re = re_ref[...].astype(jnp.float32)
    im = im_ref[...].astype(jnp.float32)
    sq = re * re + im * im
    nz = sq > 0.0
    inv_mag = jax.lax.rsqrt(jnp.where(nz, sq, 1.0))   # EUP rsqrt (+ refine)
    mag = sq * inv_mag                                # |z|  (0 where z == 0)
    m = jnp.max(mag, axis=axis, keepdims=True)
    e = jnp.exp(mag - m)
    s = jnp.sum(e, axis=axis, keepdims=True)
    p = e * pl.reciprocal(s, approx=False)            # softmax(|z|)
    # Unit phase exp(i*angle(z)) = (re, im)/|z|;  angle(0) == 0 -> (1, 0).
    ore_ref[...] = (p * jnp.where(nz, re * inv_mag, 1.0)).astype(ore_ref.dtype)
    oim_ref[...] = (p * jnp.where(nz, im * inv_mag, 0.0)).astype(oim_ref.dtype)


# ---------------------------------------------------------------------------
# Tiling plans (pure reshapes of the input, no data movement in the wrapper).
# ---------------------------------------------------------------------------

def _plan_last(rows, d, itemsize, sub):
    """Softmax dim is the last axis: 2D (rows, d) slab, reduce along lanes."""
    row_bytes = max(1, d * itemsize)
    if rows > sub and sub * row_bytes > _MAX_BLOCK_BYTES:
        # TODO(synk): add an online-softmax fallback (grid the reduce axis with
        # "arbitrary" semantics + m/l/acc scratch) for very large reduce axes.
        raise NotImplementedError(
            f"ComplexSoftmax Pallas kernel: reduce axis d={d} needs a "
            f"{sub * row_bytes}-byte block, over the {_MAX_BLOCK_BYTES}-byte cap.")
    tr = max(sub, (_TARGET_BLOCK_BYTES // row_bytes) // sub * sub)
    if tr >= rows:
        tr = rows                          # full-extent block dim is always legal
    # v7x megacore: make sure there are >= 2 grid steps whenever rows allow it,
    # so "parallel" semantics actually shard across both TensorCores.
    if pl.cdiv(rows, tr) < 2 and rows >= 2 * sub:
        tr = _round_up(pl.cdiv(rows, 2), sub)
    grid = (pl.cdiv(rows, tr),)
    return grid, (tr, d), (lambda i: (i, 0)), -1


def _plan_mid(outer, d, inner, itemsize, sub):
    """Softmax dim is interior: 3D (outer, d, inner), reduce along sublanes.

    The lane (trailing) block dim is kept a multiple of 128 or the full
    `inner`, so stores stay unmasked wherever the shape allows.  When
    inner < 128 the stores are masked sub-128-lane accesses (slower but
    correct) — grouping outer slabs onto lanes is not a pure reshape of this
    layout, so it is not attempted here.
    """
    slab = d * inner * itemsize            # one full softmax slab per outer index
    if slab <= _TARGET_BLOCK_BYTES:
        ti = inner
        to = max(1, min(outer, _TARGET_BLOCK_BYTES // max(1, slab)))
    else:
        to = 1
        ti = max(128, (_TARGET_BLOCK_BYTES // max(1, d * itemsize)) // 128 * 128)
        if ti >= inner:
            ti = inner
        if d * ti * itemsize > _MAX_BLOCK_BYTES:
            # TODO(synk): online-softmax fallback (grid the reduce axis) for huge d.
            raise NotImplementedError(
                f"ComplexSoftmax Pallas kernel: reduce axis d={d} (inner={inner}) "
                f"needs a block over the {_MAX_BLOCK_BYTES}-byte cap.")
    # v7x megacore: >= 2 grid steps when the shape allows.
    if pl.cdiv(outer, to) * pl.cdiv(inner, ti) < 2:
        if outer >= 2:
            to = pl.cdiv(outer, 2)
        elif ti == inner and inner >= 256:
            ti = _round_up(pl.cdiv(inner, 2), 128)
    grid = (pl.cdiv(outer, to), pl.cdiv(inner, ti))
    return grid, (to, d, ti), (lambda i, j: (i, 0, j)), 1


def _softmax_planes(planes, dim, complex_mode):
    """Run the Pallas softmax kernel on one (real) or two (re, im) planes."""
    shape = planes[0].shape
    ndim = len(shape)
    dim = dim % ndim
    d = shape[dim]
    outer = math.prod(shape[:dim])
    inner = math.prod(shape[dim + 1:])
    dtype = planes[0].dtype
    itemsize = dtype.itemsize
    sub = _sublane(dtype)

    if inner == 1:
        grid, block, index_map, axis = _plan_last(outer, d, itemsize, sub)
        view_shape = (outer, d)
    else:
        grid, block, index_map, axis = _plan_mid(outer, d, inner, itemsize, sub)
        view_shape = (outer, d, inner)

    views = tuple(p.reshape(view_shape) for p in planes)
    spec = pl.BlockSpec(block, index_map)
    n_in = len(views)
    n_out = 2 if complex_mode else 1
    kernel = functools.partial(
        _complex_softmax_kernel if complex_mode else _real_softmax_kernel,
        axis=axis)
    out_shape = tuple(
        jax.ShapeDtypeStruct(view_shape, dtype) for _ in range(n_out))

    n = math.prod(view_shape)
    cost = pl.CostEstimate(
        flops=(12 if complex_mode else 5) * n,
        transcendentals=(2 if complex_mode else 1) * n,
        bytes_accessed=(n_in + n_out) * itemsize * n)

    outs = pl.pallas_call(
        kernel,
        out_shape=out_shape if n_out > 1 else out_shape[0],
        grid=grid,
        in_specs=[spec] * n_in,
        out_specs=tuple([spec] * n_out) if n_out > 1 else spec,
        compiler_params=pltpu.CompilerParams(
            dimension_semantics=("parallel",) * len(grid),
            vmem_limit_bytes=_VMEM_LIMIT_BYTES,
            # Let XLA fuse the jnp.real/jnp.imag extraction (complex split)
            # directly into the pallas_call operands instead of materializing
            # two f32 planes in HBM — kernel is HBM-bound.
            allow_input_fusion=[True] * n_in,
        ),
        cost_estimate=cost,
    )(*views)
    if n_out == 1:
        outs = (outs,)
    return tuple(o.reshape(shape) for o in outs)


@functools.partial(jax.jit, static_argnames=("dim",))
def complex_softmax(z, dim):
    """ComplexSoftmax.forward: softmax(|z|, dim)*exp(i*angle(z)) for complex z,
    plain softmax(z, dim) for real z."""
    if jnp.iscomplexobj(z):
        # TODO(synk): lax.bitcast_convert_type rejects complex dtypes, so the
        # split/recombine around the kernel cannot be a zero-copy bitcast view;
        # allow_input_fusion removes the split pass, the recombine pass remains.
        re = jnp.real(z).astype(jnp.float32)
        im = jnp.imag(z).astype(jnp.float32)
        ore, oim = _softmax_planes((re, im), dim, complex_mode=True)
        return jax.lax.complex(ore, oim).astype(z.dtype)
    native = z.dtype in (jnp.float32, jnp.bfloat16)
    x = z if native else z.astype(jnp.float32)
    out = _softmax_planes((x,), dim, complex_mode=False)[0]
    return out.astype(z.dtype)


# ---------------------------------------------------------------------------
# Pure-JAX reference.
# ---------------------------------------------------------------------------

def complex_softmax_ref(z, dim):
    if jnp.iscomplexobj(z):
        mag = jnp.abs(z)
        p = jax.nn.softmax(mag, axis=dim)
        ph = jnp.angle(z)
        return jax.lax.complex(p * jnp.cos(ph), p * jnp.sin(ph)).astype(z.dtype)
    return jax.nn.softmax(z, axis=dim)


if __name__ == "__main__":
    key = jax.random.PRNGKey(0)
    k1, k2, k3 = jax.random.split(key, 3)

    # Complex NCHW-ish feature map: batch=2, channels=4, 16x16 spatial.
    re = jax.random.normal(k1, (2, 4, 16, 16), dtype=jnp.float32)
    im = jax.random.normal(k2, (2, 4, 16, 16), dtype=jnp.float32)
    z = jax.lax.complex(re, im)

    # Real input for the real branch.
    x = jax.random.normal(k3, (2, 4, 16, 16), dtype=jnp.float32)

    # --- complex branch, softmax over the last axis (lane-reduce layout) ---
    out_c_last = jax.block_until_ready(complex_softmax(z, dim=-1))
    ref_c_last = complex_softmax_ref(z, dim=-1)
    assert out_c_last.shape == z.shape and out_c_last.dtype == z.dtype
    assert jnp.allclose(out_c_last, ref_c_last, atol=1e-5, rtol=1e-5)

    # --- complex branch, softmax over channels (sublane-reduce layout) ---
    out_c_mid = jax.block_until_ready(complex_softmax(z, dim=1))
    ref_c_mid = complex_softmax_ref(z, dim=1)
    assert jnp.allclose(out_c_mid, ref_c_mid, atol=1e-5, rtol=1e-5)

    # --- real branch, f32 ---
    out_r = jax.block_until_ready(complex_softmax(x, dim=1))
    ref_r = jax.nn.softmax(x, axis=1)
    assert out_r.shape == x.shape and out_r.dtype == x.dtype
    assert jnp.allclose(out_r, ref_r, atol=1e-5, rtol=1e-5)

    # --- real branch, bf16 rides HBM in native dtype (half the traffic) ---
    xb = x.astype(jnp.bfloat16)
    out_b = jax.block_until_ready(complex_softmax(xb, dim=-1))
    ref_b = jax.nn.softmax(xb.astype(jnp.float32), axis=-1)
    assert out_b.dtype == jnp.bfloat16
    assert jnp.allclose(out_b.astype(jnp.float32), ref_b, atol=2e-2, rtol=2e-2)

    print("KERNEL_OK")
</pallas_src>

<mosaic_0001>
module attributes {stable_mosaic.version = 11 : i64} {
  func.func @_complex_softmax_kernel(%arg0: i32, %arg1: memref<64x16xf32, #tpu.memory_space<vmem>>, %arg2: memref<64x16xf32, #tpu.memory_space<vmem>>, %arg3: memref<64x16xf32, #tpu.memory_space<vmem>>, %arg4: memref<64x16xf32, #tpu.memory_space<vmem>>) attributes {dimension_semantics = [#tpu.dimension_semantics<parallel>], iteration_bounds = array<i64: 2>, scalar_prefetch = 0 : i64, scratch_operands = 0 : i64, tpu.core_type = #tpu.core_type<tc>, window_params = [{transform_indices = @transform_0, window_bounds = array<i64: 64, 16>}, {transform_indices = @transform_1, window_bounds = array<i64: 64, 16>}, {transform_indices = @transform_2, window_bounds = array<i64: 64, 16>}, {transform_indices = @transform_3, window_bounds = array<i64: 64, 16>}]} {
    %c0 = arith.constant 0 : index
    %c0_0 = arith.constant 0 : index
    %0 = vector.load %arg1[%c0, %c0_0] : memref<64x16xf32, #tpu.memory_space<vmem>>, vector<64x16xf32>
    %c0_1 = arith.constant 0 : index
    %c0_2 = arith.constant 0 : index
    %1 = vector.load %arg2[%c0_1, %c0_2] : memref<64x16xf32, #tpu.memory_space<vmem>>, vector<64x16xf32>
    %2 = arith.mulf %0, %0 : vector<64x16xf32>
    %3 = arith.mulf %1, %1 : vector<64x16xf32>
    %4 = arith.addf %2, %3 : vector<64x16xf32>
    %cst = arith.constant 0.000000e+00 : f32
    %5 = vector.broadcast %cst : f32 to vector<64x16xf32>
    %6 = arith.cmpf ogt, %4, %5 : vector<64x16xf32>
    %cst_3 = arith.constant 1.000000e+00 : f32
    %7 = vector.broadcast %cst_3 : f32 to vector<64x16xf32>
    %8 = arith.select %6, %4, %7 : vector<64x16xi1>, vector<64x16xf32>
    %9 = math.rsqrt %8 : vector<64x16xf32>
    %10 = arith.mulf %4, %9 : vector<64x16xf32>
    %cst_4 = arith.constant dense<0xFF800000> : vector<64xf32>
    %11 = vector.multi_reduction <maximumf>, %10, %cst_4 [1] : vector<64x16xf32> to vector<64xf32>
    %12 = vector.shape_cast %11 : vector<64xf32> to vector<64x1xf32>
    %13 = vector.broadcast %12 : vector<64x1xf32> to vector<64x16xf32>
    %14 = arith.subf %10, %13 : vector<64x16xf32>
    %15 = math.exp %14 : vector<64x16xf32>
    %cst_5 = arith.constant dense<0.000000e+00> : vector<64xf32>
    %16 = vector.multi_reduction <add>, %15, %cst_5 [1] : vector<64x16xf32> to vector<64xf32>
    %17 = vector.shape_cast %16 : vector<64xf32> to vector<64x1xf32>
    %18 = tpu.reciprocal %17 : vector<64x1xf32> -> vector<64x1xf32>
    %19 = vector.broadcast %18 : vector<64x1xf32> to vector<64x16xf32>
    %20 = arith.mulf %15, %19 : vector<64x16xf32>
    %21 = arith.mulf %0, %9 : vector<64x16xf32>
    %cst_6 = arith.constant 1.000000e+00 : f32
    %22 = vector.broadcast %cst_6 : f32 to vector<64x16xf32>
    %23 = arith.select %6, %21, %22 : vector<64x16xi1>, vector<64x16xf32>
    %24 = arith.mulf %20, %23 : vector<64x16xf32>
    %c0_7 = arith.constant 0 : index
    %c0_8 = arith.constant 0 : index
    %25 = vector.load %arg3[%c0_7, %c0_8] : memref<64x16xf32, #tpu.memory_space<vmem>>, vector<64x16xf32>
    tpu.vector_store %arg3[%c0_7, %c0_8], %24 {strides = array<i32>} : memref<64x16xf32, #tpu.memory_space<vmem>>, vector<64x16xf32>,
    %26 = arith.mulf %1, %9 : vector<64x16xf32>
    %cst_9 = arith.constant 0.000000e+00 : f32
    %27 = vector.broadcast %cst_9 : f32 to vector<64x16xf32>
    %28 = arith.select %6, %26, %27 : vector<64x16xi1>, vector<64x16xf32>
    %29 = arith.mulf %20, %28 : vector<64x16xf32>
    %c0_10 = arith.constant 0 : index
    %c0_11 = arith.constant 0 : index
    %30 = vector.load %arg4[%c0_10, %c0_11] : memref<64x16xf32, #tpu.memory_space<vmem>>, vector<64x16xf32>
    tpu.vector_store %arg4[%c0_10, %c0_11], %29 {strides = array<i32>} : memref<64x16xf32, #tpu.memory_space<vmem>>, vector<64x16xf32>,
    return
  }
  func.func @transform_0(%arg0: i32) -> (i32, i32) {
    %c0_i32 = arith.constant 0 : i32
    %c0_i32_0 = arith.constant 0 : i32
    return %arg0, %c0_i32 : i32, i32
  }
  func.func @transform_1(%arg0: i32) -> (i32, i32) {
    %c0_i32 = arith.constant 0 : i32
    %c0_i32_0 = arith.constant 0 : i32
    return %arg0, %c0_i32 : i32, i32
  }
  func.func @transform_2(%arg0: i32) -> (i32, i32) {
    %c0_i32 = arith.constant 0 : i32
    %c0_i32_0 = arith.constant 0 : i32
    return %arg0, %c0_i32 : i32, i32
  }
  func.func @transform_3(%arg0: i32) -> (i32, i32) {
    %c0_i32 = arith.constant 0 : i32
    %c0_i32_0 = arith.constant 0 : i32
    return %arg0, %c0_i32 : i32, i32
  }
}

</mosaic_0001>

<bundles_post_ra>
// kernel: custom-call.1
= control target key start
LH: loop header
LB: loop body
LE: loop exit
PB: predicated region body
PF: predicated region fallthrough
CT: control target
= control target key end

     0   :  { %s56_s0 = inlined_call_operand.hbm [shape: c64[2,4,16,16], index: 0, kind: input, shape index: {}]   ;;  %s57_s1 = inlined_call_operand.vmem [shape: f32[2,4,16,16], index: 1, kind: output, shape index: {}]  }
   0x1   :  { %s2_s8 = scalar_lea.hbm %s56_s0, 128 }
   0x2   :  { %3 = vsyncpa [#allocation0], 0  ;;  %s5_s9 = sshll.u32 %s2_s8, 4  ;;  %s7_s12 = sshll.u32 %s57_s1, 4  ;;  %s6_s9 = int_to_ptr.hbm [resolvable:$true] %s5_s9  ;;  %s8_s12 = int_to_ptr.vmem [resolvable:$true] %s7_s12 }
   0x3   :  { %10 = dma.hbm_to_vmem [thread:$0]  %s6_s9, 2048, %s8_s12, [#allocation0] }
   0x4   :  { %38 = dma.done.wait [#allocation0], 2048  }
   0x5   :  { %39 = vsyncadd [#allocation0], 4294965248 }
   0x6   :  { %13 = vsyncpa [#allocation0], 1 }

// kernel: custom-call.2
= control target key start
LH: loop header
LB: loop body
LE: loop exit
PB: predicated region body
PF: predicated region fallthrough
CT: control target
= control target key end

     0   :  { %s105_s0 = inlined_call_operand.vmem [shape: f32[2,4,16,16], index: 0, kind: input, shape index: {}]   ;;  %s106_s1 = inlined_call_operand.vmem [shape: f32[2,4,16,16], index: 1, kind: input, shape index: {}]   ;;  %s107_s2 = inlined_call_operand.hbm [shape: c64[2,4,16,16], index: 2, kind: output, shape index: {}]  }
   0x1   :  { %s3_s11 = scalar_lea.hbm %s107_s2, 128 }
   0x2   :  { %4 = vsyncpa [#allocation0], 0  ;;  %s6_s14 = sshll.u32 %s105_s0, 4  ;;  %s8_s17 = sshll.u32 %s107_s2, 4  ;;  %s7_s14 = int_to_ptr.vmem [resolvable:$true] %s6_s14  ;;  %s9_s17 = int_to_ptr.hbm [resolvable:$true] %s8_s17 }
   0x3   :  { %11 = dma.vmem_to_hbm [thread:$0]  %s7_s14, 2048, %s9_s17, [#allocation0] }
   0x4   :  { %74 = dma.done.wait [#allocation0], 2048  }
   0x5   :  { %75 = vsyncadd [#allocation0], 4294965248 }
   0x6   :  { %14 = vsyncpa [#allocation0], 1 }
   0x7   :  { %15 = vsyncpa [#allocation1], 0  ;;  %s17_s20 = sshll.u32 %s106_s1, 4  ;;  %s19_s21 = sshll.u32 %s3_s11, 4  ;;  %s18_s20 = int_to_ptr.vmem [resolvable:$true] %s17_s20  ;;  %s20_s21 = int_to_ptr.hbm [resolvable:$true] %s19_s21 }
   0x8   :  { %22 = dma.vmem_to_hbm [thread:$0]  %s18_s20, 2048, %s20_s21, [#allocation1] }
   0x9   :  { %76 = dma.done.wait [#allocation1], 2048  }
   0xa   :  { %77 = vsyncadd [#allocation1], 4294965248 }
   0xb   :  { %25 = vsyncpa [#allocation1], 1 }

// kernel: custom-call
= control target key start
LH: loop header
LB: loop body
LE: loop exit
PB: predicated region body
PF: predicated region fallthrough
CT: control target
= control target key end

     0   :  { %2 = vsyncpa [#allocation0], 0  ;;  %s55_s0 = inlined_call_operand.hbm [shape: c64[2,4,16,16], index: 0, kind: input, shape index: {}]   ;;  %s56_s1 = inlined_call_operand.vmem [shape: f32[2,4,16,16], index: 1, kind: output, shape index: {}]  }
   0x1   :  { %s4_s8 = sshll.u32 %s55_s0, 4  ;;  %s6_s11 = sshll.u32 %s56_s1, 4  ;;  %s5_s8 = int_to_ptr.hbm [resolvable:$true] %s4_s8  ;;  %s7_s11 = int_to_ptr.vmem [resolvable:$true] %s6_s11 }
   0x2   :  { %9 = dma.hbm_to_vmem [thread:$0]  %s5_s8, 2048, %s7_s11, [#allocation0] }
   0x3   :  { %37 = dma.done.wait [#allocation0], 2048  }
   0x4   :  { %38 = vsyncadd [#allocation0], 4294965248 }
   0x5   :  { %12 = vsyncpa [#allocation0], 1 }

// kernel: complex_softmax.1
= control target key start
LH: loop header
LB: loop body
LE: loop exit
PB: predicated region body
PF: predicated region fallthrough
CT: control target
= control target key end

     0   :  { %s812_s12 = smov 0   ;;  %s1369_s0 = inlined_call_operand.vmem [shape: f32[128,16], index: 0, kind: input, shape index: {}]   ;;  %s1370_s1 = inlined_call_operand.vmem [shape: f32[128,16], index: 1, kind: input, shape index: {}]   ;;  %s1371_s2 = inlined_call_operand.vmem [shape: f32[128,16], index: 2, kind: output, shape index: {0}]   ;;  %s1372_s3 = inlined_call_operand.vmem [shape: f32[128,16], index: 3, kind: output, shape index: {1}]  }
   0x1 LB: > { %s713_s13 = sadd.s32 4294967295, %s790_s12   ;;  %p717_p0 = scmp.ge.s32.totalorder %s790_s12, 1  ;;  %s790_s12 = sphi %s812_s12, %s14_s12  }
   0x2   : > { %p152_p1 = scmp.lt.s32.totalorder %s790_s12, 3 }
   0x4   : > { %p153_p2 = pnand %p717_p0, %p152_p1 }
   0x5   : > { %s718_s14 = sshll.u32 (!%p153_p2), %s713_s13, 3 }
   0x6   : > { %156 = sbr.rel (%p153_p2) target bundleno = 340 (0x154), region = 28  ;;  %p187_p3 = scmp.lt.s32.totalorder (!%p153_p2), %s718_s14, 15 }
   0xb   : > { %s1407_s14 = smov (!%p187_p3, %s718_s14), 15  ;;  %vm354_vm10 = vcmask 130048  }
   0xc   : > { %s820_s15 = sshll.u32 %s1407_s14, 3 }
   0xd   : > { %s826_s18 = scalar_lea.vmem %s1369_s0, %s820_s15  ;;  %s832_s21 = scalar_lea.vmem %s1370_s1, %s820_s15 }
   0xe   : > { %v835_v0 = vld [vmem:[%s826_s18 + $0x20] sm:$0xff]  ;;  %v841_v2 = vld [vmem:[%s826_s18 + $0x10] sm:$0xff]  ;;  %v865_v12 = vld [vmem:[%s826_s18 + $0x28] sm:$0xff]  ;;  %s1267_s24 = scalar_lea.vmem %s1371_s2, %s820_s15  ;;  %s1275_s27 = scalar_lea.vmem %s1372_s3, %s820_s15 }
   0xf   : > { %v838_v1 = vld [vmem:[%s832_s21 + $0x20] sm:$0xff]  ;;  %v230_v3 = vmul.f32 %v835_v0, %v835_v0  ;;  %v848_v5 = vld [vmem:[%s832_s21 + $0x10] sm:$0xff]  ;;  %v228_v6 = vmul.f32 %v841_v2, %v841_v2  ;;  %v868_v13 = vld [vmem:[%s832_s21 + $0x28] sm:$0xff]  ;;  %v231_v16 = vmul.f32 %v865_v12, %v865_v12 }
  0x10   : > { %v238_v4 = vmul.f32 %v838_v1, %v838_v1  ;;  %v853_v7 = vld [vmem:[%s826_s18] sm:$0xff]  ;;  %v236_v9 = vmul.f32 %v848_v5, %v848_v5  ;;  %v871_v14 = vld [vmem:[%s826_s18 + $0x18] sm:$0xff]  ;;  %v239_v17 = vmul.f32 %v868_v13, %v868_v13  ;;  %v885_v20 = vld [vmem:[%s826_s18 + $0x8] sm:$0xff] }
  0x11   : > { %v856_v8 = vld [vmem:[%s832_s21] sm:$0xff]  ;;  %v226_v10 = vmul.f32 %v853_v7, %v853_v7  ;;  %v880_v18 = vld [vmem:[%s832_s21 + $0x18] sm:$0xff]  ;;  %v229_v19 = vmul.f32 %v871_v14, %v871_v14  ;;  %v888_v21 = vld [vmem:[%s832_s21 + $0x8] sm:$0xff]  ;;  %v227_v26 = vmul.f32 %v885_v20, %v885_v20 }
  0x12   : > { %v234_v11 = vmul.f32 %v856_v8, %v856_v8  ;;  %v873_v15 = vadd.f32 %v238_v4, %v230_v3  ;;  %v890_v22 = vadd.f32 %v236_v9, %v228_v6  ;;  %v237_v24 = vmul.f32 %v880_v18, %v880_v18  ;;  %v904_v28 = vld [vmem:[%s826_s18 + $0x30] sm:$0xff]  ;;  %v934_v35 = vld [vmem:[%s826_s18 + $0x38] sm:$0xff] }
  0x13   : > { %v897_v25 = vadd.f32 %v239_v17, %v231_v16  ;;  %v235_v27 = vmul.f32 %v888_v21, %v888_v21  ;;  %v927_v33 = vld [vmem:[%s832_s21 + $0x30] sm:$0xff]  ;;  %v232_v34 = vmul.f32 %v904_v28, %v904_v28  ;;  %v946_v38 = vld [vmem:[%s832_s21 + $0x38] sm:$0xff]  ;;  %v233_v41 = vmul.f32 %v934_v35, %v934_v35 }
  0x14   : > { %v892_v23 = vadd.f32 %v234_v11, %v226_v10  ;;  %vm254_vm0 = vcmp.gt.f32.partialorder %v873_v15, 0.0  ;;  %vm1378_vm1 = vcmp.gt.f32.partialorder %v890_v22, 0.0  ;;  %v913_v30 = vadd.f32 %v237_v24, %v229_v19 }
  0x15   : > { %v909_v29 = vsel %vm254_vm0, %v873_v15, 1.0  ;;  %v919_v31 = vsel %vm1378_vm1, %v890_v22, 1.0  ;;  %vm1376_vm3 = vcmp.gt.f32.partialorder %v897_v25, 0.0  ;;  %v943_v37 = vadd.f32 %v235_v27, %v227_v26 }
  0x16   : > { %vm1377_vm2 = vcmp.gt.f32.partialorder %v892_v23, 0.0  ;;  %736 = vrsqrt.f32 %v909_v29  ;;  %v940_v36 = vsel %vm1376_vm3, %v897_v25, 1.0  ;;  %vm1375_vm4 = vcmp.gt.f32.partialorder %v913_v30, 0.0 }
  0x17   : > { %v924_v32 = vsel %vm1377_vm2, %v892_v23, 1.0  ;;  %738 = vrsqrt.f32 %v919_v31  ;;  %v952_v39 = vsel %vm1375_vm4, %v913_v30, 1.0  ;;  %v240_v40 = vmul.f32 %v927_v33, %v927_v33 }
  0x18   : > { %740 = vrsqrt.f32 %v924_v32  ;;  %vm1374_vm5 = vcmp.gt.f32.partialorder %v943_v37, 0.0  ;;  %v241_v44 = vmul.f32 %v946_v38, %v946_v38  ;;  %vm312_vm6 = vweird.f32 %v909_v29 }
  0x19   : > { %742 = vrsqrt.f32 %v940_v36  ;;  %v963_v42 = vsel %vm1374_vm5, %v943_v37, 1.0  ;;  %v965_v43 = vadd.f32 %v240_v40, %v232_v34  ;;  %vm292_vm7 = vweird.f32 %v919_v31 }
  0x1a   : > { %744 = vrsqrt.f32 %v952_v39  ;;  %vm272_vm9 = vweird.f32 %v924_v32  ;;  %v981_v51 = vadd.f32 %v241_v44, %v233_v41  ;;  %vm322_vm11 = vweird.f32 %v940_v36 }
  0x1b   : > { %746 = vrsqrt.f32 %v963_v42  ;;  %vm1373_vm8 = vcmp.gt.f32.partialorder %v965_v43, 0.0  ;;  %vm282_vm2 = vweird.f32 %v963_v42 }
  0x1c   : > { %v737_v45 = vpop.eup %736  ;;  %v979_v50 = vsel %vm1373_vm8, %v965_v43, 1.0  ;;  %vm257_vm5 = vcmp.gt.f32.partialorder %v981_v51, 0.0 }
  0x1d   : > { %v739_v46 = vpop.eup %738  ;;  %v307_v47 = vmul.f32 %v737_v45, %v909_v29  ;;  %748 = vrsqrt.f32 %v979_v50  ;;  %vm313_vm12 = vweird.f32 %v737_v45  ;;  %v1035_v44 = vsel %vm257_vm5, %v981_v51, 1.0 }
  0x1e   : > { %v741_v48 = vpop.eup %740  ;;  %v287_v49 = vmul.f32 %v739_v46, %v919_v31  ;;  %vm293_vm13 = vweird.f32 %v739_v46  ;;  %vm1006_vm4 = vmor %vm312_vm6, %vm313_vm12  ;;  %750 = vrsqrt.f32 %v1035_v44 }
  0x1f   : > { %v983_v52 = vpop.eup %742  ;;  %v308_v53 = vmul.f32 %v737_v45, %v307_v47  ;;  %v267_v54 = vmul.f32 %v741_v48, %v924_v32  ;;  %vm273_vm15 = vweird.f32 %v741_v48  ;;  %vm1018_vm1 = vmor %vm292_vm7, %vm293_vm13  ;;  %vm332_vm7 = vweird.f32 %v979_v50 }
  0x20   : > { %v988_v55 = vpop.eup %744  ;;  %v288_v56 = vmul.f32 %v739_v46, %v287_v49  ;;  %v317_v57 = vmul.f32 %v983_v52, %v940_v36  ;;  %vm323_vm8 = vweird.f32 %v983_v52  ;;  %vm1026_vm6 = vmor %vm272_vm9, %vm273_vm15  ;;  %vm1392_vm15 = vcmp.gt.f32.partialorder %v897_v25, 0.0 }
  0x21   : > { %v309_v58 = vmul.f32 0.5, %v308_v53  ;;  %v268_v59 = vmul.f32 %v741_v48, %v267_v54  ;;  %v297_v60 = vmul.f32 %v988_v55, %v952_v39  ;;  %v995_v61 = vpop.eup %746  ;;  %vm303_vm3 = vweird.f32 %v988_v55 }
  0x22   : > { %v289_v62 = vmul.f32 0.5, %v288_v56  ;;  %v318_v63 = vmul.f32 %v983_v52, %v317_v57  ;;  %v277_v9 = vmul.f32 %v995_v61, %v963_v42  ;;  %vm283_vm14 = vweird.f32 %v995_v61 }
  0x23   : > { %v310_v3 = vsub.f32 1.5, %v309_v58  ;;  %v269_v4 = vmul.f32 0.5, %v268_v59  ;;  %v298_v6 = vmul.f32 %v988_v55, %v297_v60  ;;  %v1013_v17 = vpop.eup %748  ;;  %vm284_vm13 = vmor %vm282_vm2, %vm283_vm14  ;;  %vm1394_vm2 = vcmp.gt.f32.partialorder %v913_v30, 0.0 }
  0x24   : > { %v290_v11 = vsub.f32 1.5, %v289_v62  ;;  %v319_v16 = vmul.f32 0.5, %v318_v63  ;;  %v278_v29 = vmul.f32 %v995_v61, %v277_v9  ;;  %v327_v31 = vmul.f32 %v1013_v17, %v979_v50  ;;  %vm1395_vm14 = vmmov %vm1394_vm2 }
  0x25   : > { %v311_v19 = vmul.f32 %v737_v45, %v310_v3  ;;  %v270_v26 = vsub.f32 1.5, %v269_v4  ;;  %v299_v27 = vmul.f32 0.5, %v298_v6  ;;  %vm333_vm12 = vweird.f32 %v1013_v17 }
  0x26   : > { %v291_v34 = vmul.f32 %v739_v46, %v290_v11  ;;  %v320_v41 = vsub.f32 1.5, %v319_v16  ;;  %v279_v54 = vmul.f32 0.5, %v278_v29  ;;  %v328_v10 = vmul.f32 %v1013_v17, %v327_v31 }
  0x27   : > { %v315_v47 = vsel %vm1006_vm4, %v737_v45, %v311_v19  ;;  %v271_v49 = vmul.f32 %v741_v48, %v270_v26  ;;  %v300_v53 = vsub.f32 1.5, %v299_v27  ;;  %vm1387_vm4 = vcmp.gt.f32.partialorder %v890_v22, 0.0 }
  0x28   : > { %v1040_v32 = vmul.f32 %v315_v47, %v873_v15  ;;  %v551_v56 = vmul.f32 %v315_v47, %v835_v0  ;;  %v583_v57 = vmul.f32 %v315_v47, %v838_v1  ;;  %v295_v58 = vsel %vm1018_vm1, %v739_v46, %v291_v34  ;;  %vm1071_vm1 = vmor %vm322_vm11, %vm323_vm8 }
  0x29   : > { %v1048_v59 = vmul.f32 %v295_v58, %v890_v22  ;;  %v549_v45 = vmul.f32 %v295_v58, %v841_v2  ;;  %v581_v60 = vmul.f32 %v295_v58, %v848_v5  ;;  %v275_v62 = vsel %vm1026_vm6, %v741_v48, %v271_v49  ;;  %vm1393_vm6 = vmmov %vm1392_vm15 }
  0x2a   : > { %v367_v0 = vsel %vm354_vm10, %v1040_v32, -inf  ;;  %v1058_v1 = vsel %vm254_vm0, %v551_v56, 1.0  ;;  %v1062_v46 = vsel %vm254_vm0, %v583_v57, 0.0  ;;  %v1065_v63 = vmul.f32 %v275_v62, %v892_v23  ;;  %vm1388_vm0 = vmmov %vm1387_vm4 }
  0x2b   : > { %368 = vmax.xlane.f32.xlu2 %v367_v0  ;;  %v361_v5 = vsel %vm354_vm10, %v1048_v59, -inf  ;;  %v1079_v15 = vsel %vm1387_vm4, %v549_v45, 1.0  ;;  %v1083_v48 = vsel %vm1388_vm0, %v581_v60, 0.0  ;;  %v547_v3 = vmul.f32 %v275_v62, %v853_v7 }
  0x2c   : > { %vm1389_vm8 = vweird.f32 %v952_v39  ;;  %362 = vmax.xlane.f32.xlu1 %v361_v5  ;;  %v355_v36 = vsel %vm354_vm10, %v1065_v63, -inf  ;;  %v579_v4 = vmul.f32 %v275_v62, %v856_v8  ;;  %v321_v6 = vmul.f32 %v983_v52, %v320_v41  ;;  %v751_v41 = vpop.eup %750 }
  0x2d   : > { %vm304_vm9 = vmor %vm1389_vm8, %vm303_vm3  ;;  %v301_v9 = vmul.f32 %v988_v55, %v300_v53  ;;  %vm1390_vm11 = vcmp.gt.f32.partialorder %v892_v23, 0.0  ;;  %356 = vmax.xlane.f32.xlu0 %v355_v36  ;;  %v280_v7 = vsub.f32 1.5, %v279_v54  ;;  %v329_v27 = vmul.f32 0.5, %v328_v10 }
  0x2e   : > { %v1097_v22 = vsel %vm1390_vm11, %v547_v3, 1.0  ;;  %vm1391_vm3 = vmmov %vm1390_vm11  ;;  %v325_v8 = vsel %vm1071_vm1, %v983_v52, %v321_v6  ;;  %v337_v49 = vmul.f32 %v751_v41, %v1035_v44  ;;  %vm1396_vm4 = vcmp.gt.f32.partialorder %v943_v37, 0.0 }
  0x2f   : > { %v1103_v39 = vsel %vm1391_vm3, %v579_v4, 0.0  ;;  %v305_v11 = vsel %vm304_vm9, %v988_v55, %v301_v9  ;;  %v1111_v16 = vmul.f32 %v325_v8, %v897_v25  ;;  %v552_v19 = vmul.f32 %v325_v8, %v865_v12  ;;  %vm334_vm1 = vmor %vm332_vm7, %vm333_vm12 }
  0x30   : > { %v584_v24 = vmul.f32 %v325_v8, %v868_v13  ;;  %v1116_v26 = vmul.f32 %v305_v11, %v913_v30  ;;  %v550_v23 = vmul.f32 %v305_v11, %v871_v14  ;;  %v582_v52 = vmul.f32 %v305_v11, %v880_v18  ;;  %vm1397_vm0 = vmmov %vm1396_vm4 }
  0x31   : > { %v281_v55 = vmul.f32 %v995_v61, %v280_v7  ;;  %v370_v12 = vsel %vm354_vm10, %v1111_v16, -inf  ;;  %v1129_v13 = vsel %vm1392_vm15, %v552_v19, 1.0  ;;  %v330_v40 = vsub.f32 1.5, %v329_v27 }
  0x32   : > { %v1133_v29 = vsel %vm1393_vm6, %v584_v24, 0.0  ;;  %v364_v42 = vsel %vm354_vm10, %v1116_v26, -inf  ;;  %v1139_v14 = vsel %vm1394_vm2, %v550_v23, 1.0  ;;  %v1143_v18 = vsel %vm1395_vm14, %v582_v52, 0.0 }
  0x33   : > { %v285_v34 = vsel %vm284_vm13, %v995_v61, %v281_v55  ;;  %371 = vmax.xlane.f32.xlu2 %v370_v12  ;;  %v331_v30 = vmul.f32 %v1013_v17, %v330_v40  ;;  %v338_v50 = vmul.f32 %v751_v41, %v337_v49  ;;  %vm342_vm7 = vweird.f32 %v1035_v44 }
  0x34   : > { %v347_v25 = vmul.f32 %v285_v34, %v943_v37  ;;  %v548_v31 = vmul.f32 %v285_v34, %v885_v20  ;;  %v580_v47 = vmul.f32 %v285_v34, %v888_v21  ;;  %365 = vmax.xlane.f32.xlu1 %v364_v42  ;;  %vm343_vm8 = vweird.f32 %v751_v41 }
  0x35   : > { %v335_v21 = vsel %vm334_vm1, %v1013_v17, %v331_v30  ;;  %v339_v58 = vmul.f32 0.5, %v338_v50  ;;  %vm1398_vm9 = vcmp.gt.f32.partialorder %v965_v43, 0.0  ;;  %vm344_vm3 = vmor %vm342_vm7, %vm343_vm8 }
  0x36   : > { %v358_v61 = vsel %vm354_vm10, %v347_v25, -inf  ;;  %v1158_v53 = vsel %vm1396_vm4, %v548_v31, 1.0  ;;  %v1162_v20 = vsel %vm1397_vm0, %v580_v47, 0.0  ;;  %v352_v54 = vmul.f32 %v335_v21, %v965_v43  ;;  %vm1399_vm11 = vmmov %vm1398_vm9 }
  0x37   : > { %359 = vmax.xlane.f32.xlu0 %v358_v61  ;;  %v553_v56 = vmul.f32 %v335_v21, %v904_v28  ;;  %v585_v57 = vmul.f32 %v335_v21, %v927_v33  ;;  %v340_v17 = vsub.f32 1.5, %v339_v58 }
  0x38   : > { %v373_v60 = vsel %vm354_vm10, %v352_v54, -inf }
  0x39   : > { %v1171_v45 = vsel %vm1398_vm9, %v553_v56, 1.0  ;;  %v1175_v37 = vsel %vm1399_vm11, %v585_v57, 0.0  ;;  %v341_v62 = vmul.f32 %v751_v41, %v340_v17 }
  0x3b   : > { %v345_v28 = vsel %vm344_vm3, %v751_v41, %v341_v62 }
  0x3c   : > { %v353_v33 = vmul.f32 %v345_v28, %v981_v51  ;;  %v554_v44 = vmul.f32 %v345_v28, %v934_v35  ;;  %v586_v0 = vmul.f32 %v345_v28, %v946_v38 }
  0x3e   : > { %v376_v2 = vsel %vm354_vm10, %v353_v33, -inf  ;;  %v1184_v43 = vsel %vm257_vm5, %v554_v44, 1.0  ;;  %v1188_v5 = vsel %vm257_vm5, %v586_v0, 0.0 }
  0x3f   : > { %374 = vmax.xlane.f32.xlu0 %v373_v60  ;;  %377 = vmax.xlane.f32.xlu1 %v376_v2 }
  0x9e   : > { %v369_v3 = vpop.xlane.xlu2 %368 }
  0x9f   : > { %v363_v36 = vpop.xlane.xlu1 %362  ;;  %v383_v23 = vsub.f32 %v1040_v32, %v369_v3 }
  0xa0   : > { %v381_v4 = vsub.f32 %v1048_v59, %v363_v36  ;;  %v357_v6 = vpop.xlane.xlu0 %356 }
  0xa1   : > { %v379_v35 = vsub.f32 %v1065_v63, %v357_v6 }
  0xa2   : > { %v391_v9 = vmul.f32 1.442695, %v381_v4 }
  0xa3   : > { %v387_v38 = vmul.f32 1.442695, %v379_v35 }
  0xa4   : > { %752 = vpow2.f32 %v391_v9 }
  0xa5   : > { %754 = vpow2.f32 %v387_v38 }
  0xa6   : > { %v372_v7 = vpop.xlane.xlu2 %371 }
  0xa7   : > { %v384_v10 = vsub.f32 %v1111_v16, %v372_v7  ;;  %v366_v8 = vpop.xlane.xlu1 %365 }
  0xa8   : > { %v382_v51 = vsub.f32 %v1116_v26, %v366_v8  ;;  %v395_v26 = vmul.f32 1.442695, %v383_v23 }
  0xa9   : > { %v397_v11 = vmul.f32 1.442695, %v384_v10 }
  0xaa   : > { %v360_v19 = vpop.xlane.xlu0 %359  ;;  %v1194_v24 = vpop.eup %752  ;;  %v393_v59 = vmul.f32 1.442695, %v382_v51 }
  0xab   : > { %v380_v52 = vsub.f32 %v347_v25, %v360_v19  ;;  %v1197_v55 = vpop.eup %754  ;;  %756 = vpow2.f32 %v397_v11  ;;  %v409_v63 = vsel %vm354_vm10, %v1194_v24, 0.0 }
  0xac   : > { %758 = vpow2.f32 %v393_v59  ;;  %410 = vadd.xlane.f32.xlu1 %v409_v63  ;;  %v403_v16 = vsel %vm354_vm10, %v1197_v55, 0.0 }
  0xad   : > { %v389_v27 = vmul.f32 1.442695, %v380_v52  ;;  %404 = vadd.xlane.f32.xlu2 %v403_v16 }
  0xaf   : > { %760 = vpow2.f32 %v389_v27 }
  0xb0   : > { %762 = vpow2.f32 %v395_v26 }
  0xb1   : > { %v1203_v12 = vpop.eup %756 }
  0xb2   : > { %v375_v32 = vpop.xlane.xlu0 %374  ;;  %v1205_v42 = vpop.eup %758  ;;  %v418_v40 = vsel %vm354_vm10, %v1203_v12, 0.0 }
  0xb3   : > { %v385_v34 = vsub.f32 %v352_v54, %v375_v32  ;;  %v412_v41 = vsel %vm354_vm10, %v1205_v42, 0.0  ;;  %v378_v30 = vpop.xlane.xlu1 %377 }
  0xb4   : > { %419 = vadd.xlane.f32.xlu1 %v418_v40  ;;  %v386_v49 = vsub.f32 %v353_v33, %v378_v30 }
  0xb5   : > { %v1211_v25 = vpop.eup %760  ;;  %v399_v31 = vmul.f32 1.442695, %v385_v34  ;;  %413 = vadd.xlane.f32.xlu2 %v412_v41 }
  0xb6   : > { %v406_v47 = vsel %vm354_vm10, %v1211_v25, 0.0  ;;  %v1215_v61 = vpop.eup %762  ;;  %v401_v21 = vmul.f32 1.442695, %v386_v49 }
  0xb7   : > { %764 = vpow2.f32 %v399_v31  ;;  %407 = vadd.xlane.f32.xlu0 %v406_v47  ;;  %v415_v50 = vsel %vm354_vm10, %v1215_v61, 0.0 }
  0xb8   : > { %766 = vpow2.f32 %v401_v21 }
  0xbd   : > { %v1219_v54 = vpop.eup %764 }
  0xbe   : > { %v421_v56 = vsel %vm354_vm10, %v1219_v54, 0.0  ;;  %v1223_v57 = vpop.eup %766 }
  0xbf   : > { %416 = vadd.xlane.f32.xlu0 %v415_v50  ;;  %422 = vadd.xlane.f32.xlu2 %v421_v56  ;;  %v424_v58 = vsel %vm354_vm10, %v1223_v57, 0.0 }
  0xc7   : > { %425 = vadd.xlane.f32.xlu0 %v424_v58 }
 0x11f   : > { %v411_v17 = vpop.xlane.xlu1 %410 }
 0x120   : > { %768 = vrcp.f32 %v411_v17  ;;  %v405_v60 = vpop.xlane.xlu2 %404  ;;  %v464_v0 = vand.u32 2147483647, %v411_v17  ;;  %v466_v2 = vand.u32 2147483648, %v411_v17  ;;  %vm460_vm5 = vweird.f32 %v411_v17 }
 0x121   : > { %770 = vrcp.f32 %v405_v60  ;;  %v436_v6 = vand.u32 2147483647, %v405_v60  ;;  %v438_v35 = vand.u32 2147483648, %v405_v60  ;;  %vm432_vm13 = vweird.f32 %v405_v60 }
 0x122   : > { %vm1236_vm15 = vcmp.eq.f32.partialorder %v464_v0, 8.507059e+37  ;;  %v467_v19 = vor.u32 1.1754944e-38, %v466_v2 }
 0x123   : > { %vm1241_vm2 = vcmp.eq.f32.partialorder %v436_v6, 8.507059e+37  ;;  %v439_v59 = vor.u32 1.1754944e-38, %v438_v35 }
 0x126   : > { %v769_v62 = vpop.eup %768 }
 0x127   : > { %v771_v28 = vpop.eup %770  ;;  %v456_v33 = vmul.f32 %v769_v62, %v411_v17  ;;  %v1227_v44 = vpop.xlane.xlu1 %419  ;;  %vm461_vm12 = vweird.f32 %v769_v62 }
 0x128   : > { %v428_v3 = vmul.f32 %v771_v28, %v405_v60  ;;  %772 = vrcp.f32 %v1227_v44  ;;  %v1230_v36 = vpop.xlane.xlu2 %413  ;;  %vm433_vm6 = vweird.f32 %v771_v28  ;;  %v508_v51 = vand.u32 2147483648, %v1227_v44  ;;  %vm462_vm14 = vmor %vm460_vm5, %vm461_vm12 }
 0x129   : > { %v457_v4 = vsub.f32 1.0, %v456_v33  ;;  %774 = vrcp.f32 %v1230_v36  ;;  %vm502_vm1 = vweird.f32 %v1227_v44  ;;  %v506_v27 = vand.u32 2147483647, %v1227_v44  ;;  %vm434_vm0 = vmor %vm432_vm13, %vm433_vm6 }
 0x12a   : > { %v1233_v9 = vpop.xlane.xlu0 %407  ;;  %v429_v38 = vsub.f32 1.0, %v428_v3  ;;  %vm474_vm4 = vweird.f32 %v1230_v36  ;;  %v478_v34 = vand.u32 2147483647, %v1230_v36  ;;  %v480_v40 = vand.u32 2147483648, %v1230_v36 }
 0x12b   : > { %v458_v7 = vmul.f32 %v769_v62, %v457_v4  ;;  %776 = vrcp.f32 %v1233_v9  ;;  %v509_v47 = vor.u32 1.1754944e-38, %v508_v51  ;;  %vm507_vm11 = vcmp.eq.f32.partialorder %v506_v27, 8.507059e+37 }
 0x12c   : > { %v430_v8 = vmul.f32 %v771_v28, %v429_v38  ;;  %vm479_vm12 = vcmp.eq.f32.partialorder %v478_v34, 8.507059e+37  ;;  %v481_v38 = vor.u32 1.1754944e-38, %v480_v40  ;;  %vm446_vm13 = vweird.f32 %v1233_v9 }
 0x12d   : > { %v459_v11 = vadd.f32 %v769_v62, %v458_v7 }
 0x12e   : > { %v773_v52 = vpop.eup %772  ;;  %v431_v63 = vadd.f32 %v771_v28, %v430_v8 }
 0x12f   : > { %v775_v16 = vpop.eup %774  ;;  %v463_v26 = vsel %vm462_vm14, %v769_v62, %v459_v11  ;;  %v498_v32 = vmul.f32 %v773_v52, %v1227_v44  ;;  %vm503_vm7 = vweird.f32 %v773_v52 }
 0x130   : > { %v468_v41 = vsel %vm1236_vm15, %v467_v19, %v463_v26  ;;  %v435_v31 = vsel %vm434_vm0, %v771_v28, %v431_v63  ;;  %v470_v30 = vmul.f32 %v775_v16, %v1230_v36  ;;  %vm475_vm8 = vweird.f32 %v775_v16  ;;  %vm1285_vm9 = vmor %vm502_vm1, %vm503_vm7 }
 0x131   : > { %v777_v49 = vpop.eup %776  ;;  %v541_v21 = vmul.f32 %v1194_v24, %v468_v41  ;;  %v440_v50 = vsel %vm1241_vm2, %v439_v59, %v435_v31  ;;  %v499_v56 = vsub.f32 1.0, %v498_v32  ;;  %vm476_vm5 = vmor %vm474_vm4, %vm475_vm8 }
 0x132   : > { %v1259_v58 = vpop.xlane.xlu2 %422  ;;  %v1261_v17 = vpop.xlane.xlu0 %416  ;;  %v539_v60 = vmul.f32 %v1197_v55, %v440_v50  ;;  %v471_v62 = vsub.f32 1.0, %v470_v30  ;;  %v442_v24 = vmul.f32 %v777_v49, %v1233_v9  ;;  %vm447_vm3 = vweird.f32 %v777_v49 }
 0x133   : > { %v565_v28 = vmul.f32 %v1079_v15, %v541_v21  ;;  %v597_v33 = vmul.f32 %v1083_v48, %v541_v21  ;;  %v500_v0 = vmul.f32 %v773_v52, %v499_v56  ;;  %778 = vrcp.f32 %v1259_v58  ;;  %vm448_vm15 = vmor %vm446_vm13, %vm447_vm3 }
 0x134   : > { %v563_v55 = vmul.f32 %v1097_v22, %v539_v60  ;;  %v595_v2 = vmul.f32 %v1103_v39, %v539_v60  ;;  %v472_v4 = vmul.f32 %v775_v16, %v471_v62  ;;  %v443_v6 = vsub.f32 1.0, %v442_v24 }
 0x135   : > { %573 = vst.msk [vmem:[%s1267_s24 + $0x10] sm:$0xff] %vm354_vm10, %v565_v28  ;;  %v501_v15 = vadd.f32 %v773_v52, %v500_v0  ;;  %v450_v48 = vand.u32 2147483647, %v1233_v9  ;;  %v452_v22 = vand.u32 2147483648, %v1233_v9  ;;  %780 = vrcp.f32 %v1261_v17 }
 0x136   : > { %605 = vst.msk [vmem:[%s1275_s27 + $0x10] sm:$0xff] %vm354_vm10, %v597_v33  ;;  %v473_v39 = vadd.f32 %v775_v16, %v472_v4  ;;  %v444_v35 = vmul.f32 %v777_v49, %v443_v6  ;;  %vm516_vm2 = vweird.f32 %v1259_v58  ;;  %vm488_vm7 = vweird.f32 %v1261_v17 }
 0x137   : > { %571 = vst.msk [vmem:[%s1267_s24] sm:$0xff] %vm354_vm10, %v563_v55  ;;  %v505_v44 = vsel %vm1285_vm9, %v773_v52, %v501_v15  ;;  %v453_v23 = vor.u32 1.1754944e-38, %v452_v22  ;;  %vm451_vm6 = vcmp.eq.f32.partialorder %v450_v48, 8.507059e+37 }
 0x138   : > { %603 = vst.msk [vmem:[%s1275_s27] sm:$0xff] %vm354_vm10, %v595_v2  ;;  %v510_v7 = vsel %vm507_vm11, %v509_v47, %v505_v44  ;;  %v477_v10 = vsel %vm476_vm5, %v775_v16, %v473_v39  ;;  %v445_v8 = vadd.f32 %v777_v49, %v444_v35  ;;  %v494_v47 = vand.u32 2147483648, %v1261_v17 }
 0x139   : > { %v779_v51 = vpop.eup %778  ;;  %v544_v11 = vmul.f32 %v1203_v12, %v510_v7  ;;  %v482_v19 = vsel %vm479_vm12, %v481_v38, %v477_v10 }
 0x13a   : > { %v542_v36 = vmul.f32 %v1205_v42, %v482_v19  ;;  %v449_v59 = vsel %vm448_vm15, %v777_v49, %v445_v8  ;;  %v512_v52 = vmul.f32 %v779_v51, %v1259_v58  ;;  %v1310_v63 = vpop.xlane.xlu0 %425  ;;  %vm517_vm14 = vweird.f32 %v779_v51 }
 0x13b   : > { %v568_v27 = vmul.f32 %v1129_v13, %v544_v11  ;;  %v600_v9 = vmul.f32 %v1133_v29, %v544_v11  ;;  %v454_v16 = vsel %vm451_vm6, %v453_v23, %v449_v59  ;;  %v781_v12 = vpop.eup %780  ;;  %v520_v13 = vand.u32 2147483647, %v1259_v58  ;;  %vm518_vm1 = vmor %vm516_vm2, %vm517_vm14 }
 0x13c   : > { %v566_v26 = vmul.f32 %v1139_v14, %v542_v36  ;;  %v598_v42 = vmul.f32 %v1143_v18, %v542_v36  ;;  %v540_v32 = vmul.f32 %v1211_v25, %v454_v16  ;;  %v513_v34 = vsub.f32 1.0, %v512_v52 }
 0x13d   : > { %576 = vst.msk [vmem:[%s1267_s24 + $0x28] sm:$0xff] %vm354_vm10, %v568_v27  ;;  %v522_v29 = vand.u32 2147483648, %v1259_v58  ;;  %v484_v40 = vmul.f32 %v781_v12, %v1261_v17  ;;  %782 = vrcp.f32 %v1310_v63  ;;  %vm489_vm4 = vweird.f32 %v781_v12 }
 0x13e   : > { %608 = vst.msk [vmem:[%s1275_s27 + $0x28] sm:$0xff] %vm354_vm10, %v600_v9  ;;  %v564_v14 = vmul.f32 %v1158_v53, %v540_v32  ;;  %v596_v18 = vmul.f32 %v1162_v20, %v540_v32  ;;  %v514_v25 = vmul.f32 %v779_v51, %v513_v34  ;;  %v492_v53 = vand.u32 2147483647, %v1261_v17  ;;  %vm490_vm8 = vmor %vm488_vm7, %vm489_vm4 }
 0x13f   : > { %574 = vst.msk [vmem:[%s1267_s24 + $0x18] sm:$0xff] %vm354_vm10, %v566_v26  ;;  %v485_v41 = vsub.f32 1.0, %v484_v40  ;;  %v523_v30 = vor.u32 1.1754944e-38, %v522_v29  ;;  %vm521_vm0 = vcmp.eq.f32.partialorder %v520_v13, 8.507059e+37  ;;  %v495_v58 = vor.u32 1.1754944e-38, %v494_v47 }
 0x140   : > { %606 = vst.msk [vmem:[%s1275_s27 + $0x18] sm:$0xff] %vm354_vm10, %v598_v42  ;;  %v515_v31 = vadd.f32 %v779_v51, %v514_v25  ;;  %vm493_vm9 = vcmp.eq.f32.partialorder %v492_v53, 8.507059e+37  ;;  %v536_v17 = vand.u32 2147483648, %v1310_v63  ;;  %v534_v3 = vand.u32 2147483647, %v1310_v63 }
 0x141   : > { %572 = vst.msk [vmem:[%s1267_s24 + $0x8] sm:$0xff] %vm354_vm10, %v564_v14  ;;  %v486_v49 = vmul.f32 %v781_v12, %v485_v41  ;;  %vm530_vm3 = vweird.f32 %v1310_v63 }
 0x142   : > { %604 = vst.msk [vmem:[%s1275_s27 + $0x8] sm:$0xff] %vm354_vm10, %v596_v18  ;;  %v519_v20 = vsel %vm518_vm1, %v779_v51, %v515_v31  ;;  %vm535_vm12 = vcmp.eq.f32.partialorder %v534_v3, 8.507059e+37 }
 0x143   : > { %v783_v21 = vpop.eup %782  ;;  %v524_v50 = vsel %vm521_vm0, %v523_v30, %v519_v20  ;;  %v487_v56 = vadd.f32 %v781_v12, %v486_v49 }
 0x144   : > { %v545_v60 = vmul.f32 %v1219_v54, %v524_v50  ;;  %v526_v62 = vmul.f32 %v783_v21, %v1310_v63  ;;  %vm531_vm11 = vweird.f32 %v783_v21 }
 0x145   : > { %v491_v24 = vsel %vm490_vm8, %v781_v12, %v487_v56  ;;  %vm532_vm5 = vmor %vm530_vm3, %vm531_vm11 }
 0x146   : > { %v569_v28 = vmul.f32 %v1171_v45, %v545_v60  ;;  %v601_v33 = vmul.f32 %v1175_v37, %v545_v60  ;;  %v496_v0 = vsel %vm493_vm9, %v495_v58, %v491_v24  ;;  %v527_v55 = vsub.f32 1.0, %v526_v62 }
 0x147   : > { %v543_v2 = vmul.f32 %v1215_v61, %v496_v0  ;;  %v537_v61 = vor.u32 1.1754944e-38, %v536_v17 }
 0x148   : > { %577 = vst.msk [vmem:[%s1267_s24 + $0x30] sm:$0xff] %vm354_vm10, %v569_v28  ;;  %v528_v54 = vmul.f32 %v783_v21, %v527_v55 }
 0x149   : > { %609 = vst.msk [vmem:[%s1275_s27 + $0x30] sm:$0xff] %vm354_vm10, %v601_v33  ;;  %v567_v45 = vmul.f32 %v1058_v1, %v543_v2  ;;  %v599_v37 = vmul.f32 %v1062_v46, %v543_v2 }
 0x14a   : > { %v529_v4 = vadd.f32 %v783_v21, %v528_v54 }
 0x14b   : > { %575 = vst.msk [vmem:[%s1267_s24 + $0x20] sm:$0xff] %vm354_vm10, %v567_v45 }
 0x14c   : > { %607 = vst.msk [vmem:[%s1275_s27 + $0x20] sm:$0xff] %vm354_vm10, %v599_v37  ;;  %v533_v6 = vsel %vm532_vm5, %v783_v21, %v529_v4 }
 0x14d   : > { %v538_v15 = vsel %vm535_vm12, %v537_v61, %v533_v6 }
 0x14e   : > { %v546_v48 = vmul.f32 %v1223_v57, %v538_v15 }
 0x150   : > { %v570_v22 = vmul.f32 %v1184_v43, %v546_v48  ;;  %v602_v1 = vmul.f32 %v1188_v5, %v546_v48 }
 0x152   : > { %578 = vst.msk [vmem:[%s1267_s24 + $0x38] sm:$0xff] %vm354_vm10, %v570_v22 }
 0x153   : > { %610 = vst.msk [vmem:[%s1275_s27 + $0x38] sm:$0xff] %vm354_vm10, %v602_v1 }
 0x154 PF: > { %s14_s12 = sadd.s32 1, %s790_s12  }
 0x155   : > { %p11_p4 = scmp.ge.s32.totalorder %s14_s12, 4  }
 0x157   :  { %13 = sbr.rel (!%p11_p4) target bundleno = 1 (0x1), region = 73 }

</bundles_post_ra>
